<compile_context>
chip_gen: v7x
topology: tpu7x:2x2x1
jax: 0.10.0
libtpu: 0.0.40
codegen_flags: <defaults>
</compile_context>

<pallas_src>
import functools

import jax
import jax.numpy as jnp
from jax import lax
from jax.experimental import pallas as pl
from jax.experimental.pallas import tpu as pltpu


def _round_up(x, m):
    return (x + m - 1) // m * m


# --------------------------------------------------------------------------------------
# kernel 1: z = dropout(feat) @ W   (bf16 MXU, f32 accumulate, bf16 output)
# --------------------------------------------------------------------------------------
def _z_kernel(x_ref, dscale_ref, w_ref, z_ref):
    xb = x_ref[...].astype(jnp.bfloat16) * dscale_ref[...]          # dropout (mask pre-scaled)
    z = jnp.dot(xb, w_ref[...], preferred_element_type=jnp.float32)  # bf16 x bf16 -> f32
    z_ref[0] = z.astype(z_ref.dtype)                                 # (tile, F) bf16 block


# --------------------------------------------------------------------------------------
# kernel 2: h_pre = PReLU_1(A @ z + b); per-row-tile partial BN stats [sum], [sumsq]
# --------------------------------------------------------------------------------------
def _agg_kernel(alpha1, n_real, tile,
                adj_ref, z_ref, b_ref,           # inputs  (adj streamed, z/b resident)
                h_ref, s1_ref, s2_ref,           # outputs
                acc_ref):                        # scratch
    # Read grid coordinates ONCE at the top level; only values go into pl.when bodies.
    k = pl.program_id(1)
    n_k = pl.num_programs(1)
    row_start = pl.program_id(0) * tile

    @pl.when(k == 0)
    def _():
        acc_ref[...] = jnp.zeros_like(acc_ref)

    # z is whole-array resident in VMEM (single buffer); a leading-axis dynamic index is an
    # aligned whole-tile view (never crosses an (8,128) boundary), so no VMEM copy per step.
    zk = z_ref[k]                                                    # (tile, F) bf16
    acc_ref[...] += jnp.dot(adj_ref[...], zk, preferred_element_type=jnp.float32)

    @pl.when(k == n_k - 1)
    def _():
        h = acc_ref[...] + b_ref[...]                                # GraphConv bias
        h = jnp.where(h >= 0.0, h, jnp.float32(alpha1) * h)          # GraphConv's PReLU
        h_ref[...] = h.astype(h_ref.dtype)                           # bf16 writeback

        # partial BatchNorm statistics; mask out padded rows (global row id >= n_real).
        row = row_start + lax.broadcasted_iota(jnp.int32, h.shape, 0)
        valid = (row < n_real).astype(jnp.float32)
        hv = h * valid
        s1_ref[0] = jnp.sum(hv, axis=0, keepdims=True)               # (1, F)
        s2_ref[0] = jnp.sum(hv * hv, axis=0, keepdims=True)          # (1, F)


# --------------------------------------------------------------------------------------
# kernel 3: BatchNorm apply (h*scale + shift) followed by the outer PReLU
# --------------------------------------------------------------------------------------
def _bn_act_kernel(alpha2, h_ref, scale_ref, shift_ref, out_ref):
    y = h_ref[...].astype(jnp.float32) * scale_ref[...] + shift_ref[...]
    out_ref[...] = jnp.where(y >= 0.0, y, jnp.float32(alpha2) * y)


# --------------------------------------------------------------------------------------
# wrapper
# --------------------------------------------------------------------------------------
def encoder2_forward(feat, adj, w, b, gamma, beta, alpha1, alpha2, p_drop,
                     *, dropout_key=None, tile=256, eps=1e-5):
    """feat: [N, F_in] f32; adj: [N, N] f32 dense weighted adjacency (A[dst, src])."""
    n, f_in = feat.shape
    f_out = w.shape[1]

    # ---- pad: feature axes to 128 lanes; node axis only to `tile` (tk == tm) ----
    f_in_p = _round_up(f_in, 128)
    f_out_p = _round_up(f_out, 128)
    n_p = _round_up(n, tile)
    n_blk = n_p // tile

    feat_p = jnp.pad(feat.astype(jnp.float32), ((0, n_p - n), (0, f_in_p - f_in)))
    adj_p = jnp.pad(adj.astype(jnp.float32),
                    ((0, n_p - n), (0, n_p - n))).astype(jnp.bfloat16)
    w_p = jnp.pad(w.astype(jnp.float32),
                  ((0, f_in_p - f_in), (0, f_out_p - f_out))).astype(jnp.bfloat16)
    b_p = jnp.pad(jnp.asarray(b, jnp.float32).reshape(1, -1), ((0, 0), (0, f_out_p - f_out)))
    gamma_p = jnp.pad(jnp.asarray(gamma, jnp.float32), (0, f_out_p - f_out))
    beta_p = jnp.pad(jnp.asarray(beta, jnp.float32), (0, f_out_p - f_out))

    # ---- dropout keep-mask (training mode), pre-scaled by 1/(1-p), streamed as bf16 ----
    p = float(p_drop)
    if p >= 1.0:
        dscale = jnp.zeros(feat_p.shape, jnp.bfloat16)               # p == 1 -> all dropped
    elif p > 0.0:
        if dropout_key is None:
            dropout_key = jax.random.PRNGKey(0)
        keep = jax.random.bernoulli(dropout_key, 1.0 - p, feat_p.shape)
        dscale = (keep.astype(jnp.float32) * jnp.float32(1.0 / (1.0 - p))).astype(jnp.bfloat16)
    else:
        dscale = jnp.ones(feat_p.shape, jnp.bfloat16)

    resident_vmem = pl.BlockSpec(memory_space=pltpu.MemorySpace.VMEM)  # whole array, 1 buffer

    # ---- kernel 1: z = dropout(feat) @ W, hoisted out of the adj tile loop ----
    z = pl.pallas_call(
        _z_kernel,
        out_shape=jax.ShapeDtypeStruct((n_blk, tile, f_out_p), jnp.bfloat16),
        grid=(n_blk,),
        in_specs=[pl.BlockSpec((tile, f_in_p), lambda i: (i, 0)),    # feat tile (streamed)
                  pl.BlockSpec((tile, f_in_p), lambda i: (i, 0)),    # bf16 dropout scale tile
                  resident_vmem],                                    # W resident, single buffer
        out_specs=pl.BlockSpec((1, tile, f_out_p), lambda i: (i, 0, 0)),
        compiler_params=pltpu.CompilerParams(dimension_semantics=("parallel",)),
    )(feat_p, dscale, w_p)

    # ---- kernel 2: tiled aggregation h = PReLU_1(A @ z + b) + partial BN stats ----
    # VMEM budget (per TensorCore; z is duplicated under megacore sharding):
    #   z (n_p*F*2 B, single buffer) + 2x adj tile + 2x h tile + f32 acc + stats.
    flops = 2 * n_p * n_p * f_out_p
    bytes_accessed = (adj_p.size * 2 + z.size * 2 + n_p * f_out_p * 2
                      + 2 * n_blk * f_out_p * 4)
    h_pre, s1, s2 = pl.pallas_call(
        functools.partial(_agg_kernel, float(alpha1), n, tile),
        out_shape=(jax.ShapeDtypeStruct((n_p, f_out_p), jnp.bfloat16),
                   jax.ShapeDtypeStruct((n_blk, 1, f_out_p), jnp.float32),
                   jax.ShapeDtypeStruct((n_blk, 1, f_out_p), jnp.float32)),
        grid=(n_blk, n_blk),
        in_specs=[pl.BlockSpec((tile, tile), lambda i, k: (i, k)),   # stream adj (bf16)
                  resident_vmem,                                     # z resident, single buffer
                  resident_vmem],                                    # bias resident
        out_specs=(pl.BlockSpec((tile, f_out_p), lambda i, k: (i, 0)),
                   pl.BlockSpec((1, 1, f_out_p), lambda i, k: (i, 0, 0)),
                   pl.BlockSpec((1, 1, f_out_p), lambda i, k: (i, 0, 0))),
        scratch_shapes=[pltpu.VMEM((tile, f_out_p), jnp.float32)],
        compiler_params=pltpu.CompilerParams(
            dimension_semantics=("parallel", "arbitrary"),
            vmem_limit_bytes=48 * 1024 * 1024),                      # leave headroom on v7x (64 MiB/TC)
        cost_estimate=pl.CostEstimate(flops=flops, transcendentals=0,
                                      bytes_accessed=bytes_accessed),
    )(adj_p, z, b_p)

    # ---- tiny glue: fold per-tile partial sums into BN scale/shift (biased variance) ----
    s1t = jnp.sum(s1, axis=(0, 1))
    s2t = jnp.sum(s2, axis=(0, 1))
    mean = s1t / jnp.float32(n)
    var = jnp.maximum(s2t / jnp.float32(n) - mean * mean, 0.0)
    inv = lax.rsqrt(var + jnp.float32(eps))
    scale = (gamma_p * inv).reshape(1, f_out_p)
    shift = (beta_p - mean * gamma_p * inv).reshape(1, f_out_p)

    # ---- kernel 3: BN apply + outer PReLU; biggest row tile that divides n_p ----
    tile3 = tile
    for cand in (2048, 1024, 512):
        if n_p % cand == 0:
            tile3 = cand
            break
    out_p = pl.pallas_call(
        functools.partial(_bn_act_kernel, float(alpha2)),
        out_shape=jax.ShapeDtypeStruct((n_p, f_out_p), jnp.float32),
        grid=(n_p // tile3,),
        in_specs=[pl.BlockSpec((tile3, f_out_p), lambda i: (i, 0)),  # h_pre bf16 (streamed)
                  resident_vmem,                                     # scale
                  resident_vmem],                                    # shift
        out_specs=pl.BlockSpec((tile3, f_out_p), lambda i: (i, 0)),
        compiler_params=pltpu.CompilerParams(dimension_semantics=("parallel",)),
    )(h_pre, scale, shift)

    return out_p[:n, :f_out]


if __name__ == "__main__":
    N, F_IN, F_OUT, P1 = 16, 32, 32, 0.2

    key = jax.random.PRNGKey(0)
    k_feat, k_w, k_mask, k_wt, k_drop = jax.random.split(key, 5)

    # node features
    feat = jax.random.normal(k_feat, (N, F_IN), jnp.float32)

    # GraphConv parameters (deterministic synthetic init; DGL default bias = 0)
    w = jax.random.normal(k_w, (F_IN, F_OUT), jnp.float32) * (1.0 / jnp.sqrt(F_IN))
    b = jnp.zeros((F_OUT,), jnp.float32)

    # diff_graph + edge_weight as a dense weighted adjacency A[dst, src]
    mask = (jax.random.uniform(k_mask, (N, N)) < 0.3).astype(jnp.float32)
    adj = mask * jax.random.uniform(k_wt, (N, N), jnp.float32)

    # BatchNorm affine params (PyTorch init) and the two PReLU slopes (init 0.25)
    gamma = jnp.ones((F_OUT,), jnp.float32)
    beta = jnp.zeros((F_OUT,), jnp.float32)
    alpha1 = 0.25
    alpha2 = 0.25

    out = encoder2_forward(feat, adj, w, b, gamma, beta, alpha1, alpha2, P1,
                           dropout_key=k_drop)
    jax.block_until_ready(out)
    assert out.shape == (N, F_OUT) and out.dtype == jnp.float32
    assert bool(jnp.all(jnp.isfinite(out)))
    print("KERNEL_OK")
</pallas_src>

<mosaic_0001>
module attributes {stable_mosaic.version = 11 : i64} {
  func.func @_z_kernel(%arg0: i32, %arg1: memref<256x128xf32, #tpu.memory_space<vmem>>, %arg2: memref<256x128xbf16, #tpu.memory_space<vmem>>, %arg3: memref<128x128xbf16, #tpu.memory_space<vmem>>, %arg4: memref<1x256x128xbf16, #tpu.memory_space<vmem>>) attributes {dimension_semantics = [#tpu.dimension_semantics<parallel>], iteration_bounds = array<i64: 1>, scalar_prefetch = 0 : i64, scratch_operands = 0 : i64, tpu.core_type = #tpu.core_type<tc>, window_params = [{transform_indices = @transform_0, window_bounds = array<i64: 256, 128>}, {transform_indices = @transform_1, window_bounds = array<i64: 256, 128>}, {pipeline_mode = #tpu.pipeline_mode<synchronous>, transform_indices = @transform_2, window_bounds = array<i64: 128, 128>}, {transform_indices = @transform_3, window_bounds = array<i64: 1, 256, 128>}]} {
    %c0 = arith.constant 0 : index
    %c0_0 = arith.constant 0 : index
    %0 = vector.load %arg1[%c0, %c0_0] : memref<256x128xf32, #tpu.memory_space<vmem>>, vector<256x128xf32>
    %1 = arith.truncf %0 : vector<256x128xf32> to vector<256x128xbf16>
    %c0_1 = arith.constant 0 : index
    %c0_2 = arith.constant 0 : index
    %2 = vector.load %arg2[%c0_1, %c0_2] : memref<256x128xbf16, #tpu.memory_space<vmem>>, vector<256x128xbf16>
    %3 = arith.mulf %1, %2 : vector<256x128xbf16>
    %c0_3 = arith.constant 0 : index
    %c0_4 = arith.constant 0 : index
    %4 = vector.load %arg3[%c0_3, %c0_4] : memref<128x128xbf16, #tpu.memory_space<vmem>>, vector<128x128xbf16>
    %cst = arith.constant dense<0.000000e+00> : vector<256x128xf32>
    %5 = tpu.matmul %3, %4, %cst {dimension_numbers = #tpu.dot_dimension_numbers<[1], [0], [0], [1], [0, 0, 1, 1], [], []>} : vector<256x128xbf16>, vector<128x128xbf16>, vector<256x128xf32> -> vector<256x128xf32>
    %6 = arith.truncf %5 : vector<256x128xf32> to vector<256x128xbf16>
    %c0_5 = arith.constant 0 : index
    %c0_6 = arith.constant 0 : index
    %c0_7 = arith.constant 0 : index
    %7 = vector.load %arg4[%c0_5, %c0_6, %c0_7] : memref<1x256x128xbf16, #tpu.memory_space<vmem>>, vector<1x256x128xbf16>
    %8 = vector.shape_cast %7 : vector<1x256x128xbf16> to vector<256x128xbf16>
    %9 = vector.shape_cast %6 : vector<256x128xbf16> to vector<1x256x128xbf16>
    tpu.vector_store %arg4[%c0_5, %c0_6, %c0_7], %9 {strides = array<i32>} : memref<1x256x128xbf16, #tpu.memory_space<vmem>>, vector<1x256x128xbf16>,
    return
  }
  func.func @transform_0(%arg0: i32) -> (i32, i32) {
    %c0_i32 = arith.constant 0 : i32
    %c0_i32_0 = arith.constant 0 : i32
    return %arg0, %c0_i32 : i32, i32
  }
  func.func @transform_1(%arg0: i32) -> (i32, i32) {
    %c0_i32 = arith.constant 0 : i32
    %c0_i32_0 = arith.constant 0 : i32
    return %arg0, %c0_i32 : i32, i32
  }
  func.func @transform_2(%arg0: i32) -> (i32, i32) {
    %c0_i32 = arith.constant 0 : i32
    %c0_i32_0 = arith.constant 0 : i32
    %c0_i32_1 = arith.constant 0 : i32
    return %c0_i32, %c0_i32_0 : i32, i32
  }
  func.func @transform_3(%arg0: i32) -> (i32, i32, i32) {
    %c0_i32 = arith.constant 0 : i32
    %c0_i32_0 = arith.constant 0 : i32
    %c0_i32_1 = arith.constant 0 : i32
    return %arg0, %c0_i32, %c0_i32_0 : i32, i32, i32
  }
}

</mosaic_0001>

<bundles_post_ra>
// kernel: tpu_custom_call.1
= control target key start
LH: loop header
LB: loop body
LE: loop exit
PB: predicated region body
PF: predicated region fallthrough
CT: control target
= control target key end

     0   :  { %8 = vsyncpa [#allocation3], 0  ;;  %s1134_s0 = inlined_call_operand.hbm [shape: f32[256,128], index: 0, kind: input, shape index: {}]   ;;  %s1135_s1 = inlined_call_operand.hbm [shape: bf16[256,128], index: 1, kind: input, shape index: {}]   ;;  %s1136_s2 = inlined_call_operand.hbm [shape: bf16[128,128], index: 2, kind: input, shape index: {}]   ;;  %s1137_s3 = inlined_call_operand.hbm [shape: bf16[1,256,128], index: 3, kind: output, shape index: {}]  }
   0x1   :  { %9 = vsyncpa [#allocation6], 0 }
   0x2   :  { %10 = vsyncpa [#allocation4], 0  ;;  %s1049_s12 = smov [#allocation5]   ;;  %s955_s16 = scalar_lea.hbm %s1135_s1, 2048 }
   0x3   :  { %s28_s13 = sshll.u32 %s1049_s12, 4  ;;  %p956_p0 = scmp.ne.s32.totalorder %s1135_s1, %s955_s16  ;;  %s29_s13 = int_to_ptr.vmem [resolvable:$true] %s28_s13 }
   0x4   :  { %p959_p1 = scmp.lt.u32.totalorder %s955_s16, %s1135_s1 }
   0x6   :  { %p961_p2 = pnand %p959_p1, %p956_p0 }
   0x8   :  { %964 = shalt.err (!%p961_p2)
}
   0x9   :  { %s965_s21 = scalar_lea.vmem %s29_s13, 2048  ;;  %p970_p4 = scmp.lt.s32.totalorder %s29_s13, %s29_s13 }
   0xa   :  { %p966_p3 = scmp.ne.s32.totalorder %s29_s13, %s965_s21  ;;  %p971_p5 = scmp.lt.s32.totalorder %s965_s21, %s965_s21 }
   0xc   :  { %p972_p6 = por %p971_p5, %p970_p4 }
   0xe   :  { %p973_p7 = pnand %p972_p6, %p966_p3 }
  0x10   :  { %976 = shalt.err (!%p973_p7)
}
  0x11   :  { %s1050_s22 = smov 64   ;;  %s1051_s23 = smov 4  }
  0x12   :  { %34 = dma.hbm_to_vmem [thread:$0]  %s1135_s1, 2048, %s29_s13, [#allocation6], %s1050_s22, %s1050_s22, %s1051_s23  }
  0x13   :  { %s1052_s26 = smov [#allocation2]   ;;  %s977_s30 = scalar_lea.hbm %s1134_s0, 4096 }
  0x14   :  { %s16_s27 = sshll.u32 %s1052_s26, 4  ;;  %p978_p8 = scmp.ne.s32.totalorder %s1134_s0, %s977_s30  ;;  %s17_s27 = int_to_ptr.vmem [resolvable:$true] %s16_s27 }
  0x15   :  { %p981_p9 = scmp.lt.u32.totalorder %s977_s30, %s1134_s0 }
  0x17   :  { %p983_p10 = pnand %p981_p9, %p978_p8 }
  0x19   :  { %986 = shalt.err (!%p983_p10)
}
  0x1a   :  { %s987_s8 = scalar_lea.vmem %s17_s27, 4096  ;;  %p992_p12 = scmp.lt.s32.totalorder %s17_s27, %s17_s27 }
  0x1b   :  { %p988_p11 = scmp.ne.s32.totalorder %s17_s27, %s987_s8  ;;  %p993_p13 = scmp.lt.s32.totalorder %s987_s8, %s987_s8 }
  0x1d   :  { %p994_p0 = por %p993_p13, %p992_p12 }
  0x1f   :  { %p995_p1 = pnand %p994_p0, %p988_p11 }
  0x21   :  { %998 = shalt.err (!%p995_p1)
}
  0x22   :  { %s1053_s1 = smov 128   ;;  %s1054_s9 = smov 8  }
  0x23   :  { %22 = dma.hbm_to_vmem [thread:$0]  %s1134_s0, 4096, %s17_s27, [#allocation3], %s1053_s1, %s1053_s1, %s1054_s9  }
  0x24   :  { %s1055_s12 = smov [#allocation7]   ;;  %s999_s16 = scalar_lea.hbm %s1136_s2, 1024 }
  0x25   :  { %s40_s13 = sshll.u32 %s1055_s12, 4  ;;  %p1000_p2 = scmp.ne.s32.totalorder %s1136_s2, %s999_s16  ;;  %s41_s13 = int_to_ptr.vmem [resolvable:$true] %s40_s13 }
  0x26   :  { %p1003_p3 = scmp.lt.u32.totalorder %s999_s16, %s1136_s2 }
  0x28   :  { %p1005_p4 = pnand %p1003_p3, %p1000_p2 }
  0x2a   :  { %1008 = shalt.err (!%p1005_p4)
}
  0x2b   :  { %s1009_s21 = scalar_lea.vmem %s41_s13, 1024  ;;  %p1014_p6 = scmp.lt.s32.totalorder %s41_s13, %s41_s13 }
  0x2c   :  { %p1010_p5 = scmp.ne.s32.totalorder %s41_s13, %s1009_s21  ;;  %p1015_p7 = scmp.lt.s32.totalorder %s1009_s21, %s1009_s21 }
  0x2e   :  { %p1016_p8 = por %p1015_p7, %p1014_p6 }
  0x30   :  { %p1017_p9 = pnand %p1016_p8, %p1010_p5 }
  0x32   :  { %1020 = shalt.err (!%p1017_p9)
}
  0x33   :  { %46 = dma.hbm_to_vmem [thread:$0]  %s1136_s2, 1024, %s41_s13, [#allocation6], %s1050_s22, %s1050_s22, %s1051_s23  }
  0x34   :  { %1043 = dma.done.wait [#allocation3], 4096  }
  0x35   :  { %1044 = vsyncadd [#allocation3], 4294963200 }
  0x36   :  { %1045 = dma.done.wait [#allocation6], 3072  }
  0x37   :  { %1046 = vsyncadd [#allocation6], 4294964224  ;;  %v931_v0 = vld [vmem:[#allocation7] sm:$0xff]   ;;  %v932_v1 = vld [vmem:[#allocation7 + $0x8] sm:$0xff]   ;;  %s1056_s2 = smov [#allocation8]  }
  0x38   :  { %859 = vmatprep.subr.bf16.mxu0 %v931_v0  ;;  %907 = vmatprep.subr.bf16.mxu1 %v931_v0  ;;  %v933_v2 = vld [vmem:[#allocation7 + $0x10] sm:$0xff]   ;;  %v934_v3 = vld [vmem:[#allocation7 + $0x18] sm:$0xff]   ;;  %v57_v4 = vld [vmem:[#allocation2] sm:$0xff]  ;;  %s639_s25 = sshll.u32 %s1056_s2, 4  ;;  %s640_s25 = int_to_ptr.vmem [resolvable:$true] %s639_s25 }
  0x39   :  { %860 = vmatpush3.bf16.msra.mxu0 %v931_v0  ;;  %915 = vmatpush3.bf16.msra.mxu1 %v931_v0  ;;  %v58_v5 = vld [vmem:[#allocation2 + $0x8] sm:$0xff]  ;;  %v939_v7 = vld [vmem:[#allocation5] sm:$0xff]   ;;  %v937_v16 = vld [vmem:[#allocation7 + $0x30] sm:$0xff]   ;;  %s1021_s26 = scalar_lea.vmem %s640_s25, 2048  ;;  %p1026_p11 = scmp.lt.s32.totalorder %s640_s25, %s640_s25 }
  0x3a   :  { %861 = vmatprep.subr.bf16.mxu0 %v932_v1  ;;  %908 = vmatprep.subr.bf16.mxu1 %v932_v1  ;;  %v89_v6 = vpack.c.bf16 %v58_v5, %v57_v4  ;;  %v73_v8 = vld [vmem:[#allocation2 + $0x80] sm:$0xff]  ;;  %v74_v9 = vld [vmem:[#allocation2 + $0x88] sm:$0xff]  ;;  %v59_v17 = vld [vmem:[#allocation2 + $0x10] sm:$0xff]  ;;  %p1022_p10 = scmp.ne.s32.totalorder %s640_s25, %s1021_s26  ;;  %p1027_p12 = scmp.lt.s32.totalorder %s1021_s26, %s1021_s26 }
  0x3b   :  { %v97_v11 = vpack.c.bf16 %v74_v9, %v73_v8  ;;  %v940_v12 = vld [vmem:[#allocation5 + $0x40] sm:$0xff]   ;;  %v936_v15 = vld [vmem:[#allocation7 + $0x28] sm:$0xff]   ;;  %v60_v18 = vld [vmem:[#allocation2 + $0x18] sm:$0xff] }
  0x3c   :  { %v233_v10 = vmul.bf16 %v939_v7, %v89_v6  ;;  %v935_v13 = vld [vmem:[#allocation7 + $0x20] sm:$0xff]   ;;  %v75_v19 = vld [vmem:[#allocation2 + $0x90] sm:$0xff]  ;;  %v938_v20 = vld [vmem:[#allocation7 + $0x38] sm:$0xff]   ;;  %v90_v26 = vpack.c.bf16 %v60_v18, %v59_v17  ;;  %p1028_p13 = por %p1027_p12, %p1026_p11 }
  0x3d   :  { %862 = vmatpush3.bf16.msra.mxu0 %v932_v1  ;;  %916 = vmatpush3.bf16.msra.mxu1 %v932_v1  ;;  %v241_v14 = vmul.bf16 %v940_v12, %v97_v11  ;;  %v76_v21 = vld [vmem:[#allocation2 + $0x98] sm:$0xff]  ;;  %v61_v22 = vld [vmem:[#allocation2 + $0x20] sm:$0xff]  ;;  %v62_v23 = vld [vmem:[#allocation2 + $0x28] sm:$0xff] }
  0x3e   :  { %863 = vmatprep.subr.bf16.mxu0 %v933_v2  ;;  %909 = vmatprep.subr.bf16.mxu1 %v933_v2  ;;  %v77_v24 = vld [vmem:[#allocation2 + $0xa0] sm:$0xff]  ;;  %v78_v25 = vld [vmem:[#allocation2 + $0xa8] sm:$0xff]  ;;  %v98_v28 = vpack.c.bf16 %v76_v21, %v75_v19  ;;  %v943_v30 = vld [vmem:[#allocation5 + $0x10] sm:$0xff]   ;;  %v91_v31 = vpack.c.bf16 %v62_v23, %v61_v22  ;;  %p1029_p0 = pnand %p1028_p13, %p1022_p10 }
  0x3f   :  { %875 = vmatprep.mubr.bf16.mxu0 %v233_v10  ;;  %891 = vmatprep.mubr.bf16.mxu1 %v241_v14  ;;  %v941_v27 = vld [vmem:[#allocation5 + $0x8] sm:$0xff]   ;;  %v99_v32 = vpack.c.bf16 %v78_v25, %v77_v24  ;;  %v944_v33 = vld [vmem:[#allocation5 + $0x50] sm:$0xff]   ;;  %v64_v35 = vld [vmem:[#allocation2 + $0x38] sm:$0xff] }
  0x40   :  { %v942_v29 = vld [vmem:[#allocation5 + $0x48] sm:$0xff]   ;;  %v63_v34 = vld [vmem:[#allocation2 + $0x30] sm:$0xff]  ;;  %v234_v37 = vmul.bf16 %v941_v27, %v90_v26  ;;  %v80_v39 = vld [vmem:[#allocation2 + $0xb8] sm:$0xff]  ;;  %v235_v40 = vmul.bf16 %v943_v30, %v91_v31 }
  0x41   :  { %864 = vmatpush3.bf16.msra.mxu0 %v933_v2  ;;  %917 = vmatpush3.bf16.msra.mxu1 %v933_v2  ;;  %v79_v36 = vld [vmem:[#allocation2 + $0xb0] sm:$0xff]  ;;  %v242_v38 = vmul.bf16 %v942_v29, %v98_v28  ;;  %v243_v41 = vmul.bf16 %v944_v33, %v99_v32  ;;  %v65_v42 = vld [vmem:[#allocation2 + $0x40] sm:$0xff]  ;;  %v66_v43 = vld [vmem:[#allocation2 + $0x48] sm:$0xff]  ;;  %v92_v46 = vpack.c.bf16 %v64_v35, %v63_v34 }
  0x42   :  { %865 = vmatprep.subr.bf16.mxu0 %v934_v3  ;;  %910 = vmatprep.subr.bf16.mxu1 %v934_v3  ;;  %v81_v44 = vld [vmem:[#allocation2 + $0xc0] sm:$0xff]  ;;  %v82_v45 = vld [vmem:[#allocation2 + $0xc8] sm:$0xff]  ;;  %v945_v47 = vld [vmem:[#allocation5 + $0x18] sm:$0xff]   ;;  %v100_v48 = vpack.c.bf16 %v80_v39, %v79_v36  ;;  %v93_v50 = vpack.c.bf16 %v66_v43, %v65_v42 }
  0x43   :  { %v946_v49 = vld [vmem:[#allocation5 + $0x58] sm:$0xff]   ;;  %v947_v51 = vld [vmem:[#allocation5 + $0x20] sm:$0xff]   ;;  %v101_v52 = vpack.c.bf16 %v82_v45, %v81_v44  ;;  %v236_v54 = vmul.bf16 %v945_v47, %v92_v46  ;;  %v67_v56 = vld [vmem:[#allocation2 + $0x50] sm:$0xff] }
  0x44   :  { %v948_v53 = vld [vmem:[#allocation5 + $0x60] sm:$0xff]   ;;  %v244_v55 = vmul.bf16 %v946_v49, %v100_v48  ;;  %v68_v57 = vld [vmem:[#allocation2 + $0x58] sm:$0xff]  ;;  %v237_v58 = vmul.bf16 %v947_v51, %v93_v50  ;;  %v83_v60 = vld [vmem:[#allocation2 + $0xd0] sm:$0xff] }
  0x45   :  { %866 = vmatpush3.bf16.msra.mxu0 %v934_v3  ;;  %918 = vmatpush3.bf16.msra.mxu1 %v934_v3  ;;  %v245_v59 = vmul.bf16 %v948_v53, %v101_v52  ;;  %v84_v61 = vld [vmem:[#allocation2 + $0xd8] sm:$0xff]  ;;  %v69_v62 = vld [vmem:[#allocation2 + $0x60] sm:$0xff]  ;;  %v70_v63 = vld [vmem:[#allocation2 + $0x68] sm:$0xff]  ;;  %v94_v2 = vpack.c.bf16 %v68_v57, %v67_v56 }
  0x46   :  { %867 = vmatprep.subr.bf16.mxu0 %v935_v13  ;;  %911 = vmatprep.subr.bf16.mxu1 %v935_v13  ;;  %v85_v0 = vld [vmem:[#allocation2 + $0xe0] sm:$0xff]  ;;  %v86_v1 = vld [vmem:[#allocation2 + $0xe8] sm:$0xff]  ;;  %v102_v4 = vpack.c.bf16 %v84_v61, %v83_v60  ;;  %v95_v6 = vpack.c.bf16 %v70_v63, %v69_v62  ;;  %v951_v7 = vld [vmem:[#allocation5 + $0x30] sm:$0xff]  }
  0x47   :  { %v949_v3 = vld [vmem:[#allocation5 + $0x28] sm:$0xff]   ;;  %v103_v8 = vpack.c.bf16 %v86_v1, %v85_v0  ;;  %v952_v9 = vld [vmem:[#allocation5 + $0x70] sm:$0xff]   ;;  %v88_v17 = vld [vmem:[#allocation2 + $0xf8] sm:$0xff] }
  0x48   :  { %v950_v5 = vld [vmem:[#allocation5 + $0x68] sm:$0xff]   ;;  %v238_v10 = vmul.bf16 %v949_v3, %v94_v2  ;;  %v71_v12 = vld [vmem:[#allocation2 + $0x70] sm:$0xff]  ;;  %v953_v19 = vld [vmem:[#allocation5 + $0x38] sm:$0xff]  }
  0x49   :  { %868 = vmatpush3.bf16.msra.mxu0 %v935_v13  ;;  %919 = vmatpush3.bf16.msra.mxu1 %v935_v13  ;;  %v246_v11 = vmul.bf16 %v950_v5, %v102_v4  ;;  %v239_v13 = vmul.bf16 %v951_v7, %v95_v6  ;;  %v247_v14 = vmul.bf16 %v952_v9, %v103_v8  ;;  %v954_v21 = vld [vmem:[#allocation5 + $0x78] sm:$0xff]  }
  0x4a   :  { %869 = vmatprep.subr.bf16.mxu0 %v936_v15  ;;  %912 = vmatprep.subr.bf16.mxu1 %v936_v15 }
  0x4d   :  { %870 = vmatpush3.bf16.msra.mxu0 %v936_v15  ;;  %920 = vmatpush3.bf16.msra.mxu1 %v936_v15  ;;  %v72_v15 = vld [vmem:[#allocation2 + $0x78] sm:$0xff] }
  0x4e   :  { %871 = vmatprep.subr.bf16.mxu0 %v937_v16  ;;  %913 = vmatprep.subr.bf16.mxu1 %v937_v16  ;;  %v96_v18 = vpack.c.bf16 %v72_v15, %v71_v12 }
  0x50   :  { %v240_v22 = vmul.bf16 %v953_v19, %v96_v18 }
  0x51   :  { %872 = vmatpush3.bf16.msra.mxu0 %v937_v16  ;;  %921 = vmatpush3.bf16.msra.mxu1 %v937_v16  ;;  %v87_v16 = vld [vmem:[#allocation2 + $0xf0] sm:$0xff] }
  0x52   :  { %873 = vmatprep.subr.bf16.mxu0 %v938_v20  ;;  %914 = vmatprep.subr.bf16.mxu1 %v938_v20 }
  0x55   :  { %874 = vmatpush3.bf16.msra.mxu0 %v938_v20  ;;  %922 = vmatpush3.bf16.msra.mxu1 %v938_v20  ;;  %v104_v20 = vpack.c.bf16 %v88_v17, %v87_v16 }
  0x57   :  { %v248_v23 = vmul.bf16 %v954_v21, %v104_v20 }
  0x58   :  { %876 = vmatmul.mubr.bf16.vlgmr.msra.gmra.mrb[0].mxu0 %v234_v37  ;;  %892 = vmatmul.mubr.bf16.vlgmr.msra.gmra.mrb[0].mxu1 %v242_v38 }
  0x59   :  { %879 = vmatprep.mubr.bf16.mxu0 %v235_v40  ;;  %895 = vmatprep.mubr.bf16.mxu1 %v243_v41 }
  0x60   :  { %880 = vmatmul.mubr.bf16.gmra.mrb[4].mxu0 %v236_v54  ;;  %896 = vmatmul.mubr.bf16.gmra.mrb[4].mxu1 %v244_v55 }
  0x61   :  { %883 = vmatprep.mubr.bf16.mxu0 %v237_v58  ;;  %899 = vmatprep.mubr.bf16.mxu1 %v245_v59 }
  0x68   :  { %884 = vmatmul.mubr.bf16.gmra.mrb[8].mxu0 %v238_v10  ;;  %900 = vmatmul.mubr.bf16.gmra.mrb[8].mxu1 %v246_v11 }
  0x69   :  { %887 = vmatprep.mubr.bf16.mxu0 %v239_v13  ;;  %903 = vmatprep.mubr.bf16.mxu1 %v247_v14 }
  0x70   :  { %888 = vmatmul.mubr.bf16.gmra.mrb[12].mxu0 %v240_v22  ;;  %904 = vmatmul.mubr.bf16.gmra.mrb[12].mxu1 %v248_v23 }
 0x12b   :  { %v877_v24 = vpop.f32.mrb[0].mxu0  ;;  %v893_v25 = vpop.f32.mrb[0].mxu1 }
 0x12c   :  { %v347_v26 = vpop.f32.mrb[1].mxu0  ;;  %v411_v27 = vpop.f32.mrb[1].mxu1 }
 0x12d   :  { %v878_v28 = vpop.f32.mrb[2].mxu0  ;;  %v894_v29 = vpop.f32.mrb[2].mxu1 }
 0x12e   :  { %v748_v30 = vpack.c.bf16 %v878_v28, %v877_v24  ;;  %v788_v31 = vpack.c.bf16 %v894_v29, %v893_v25  ;;  %v350_v32 = vpop.f32.mrb[3].mxu0  ;;  %v414_v33 = vpop.f32.mrb[3].mxu1 }
 0x12f   :  { %v743_v34 = vpack.c.bf16 %v350_v32, %v347_v26  ;;  %v783_v35 = vpack.c.bf16 %v414_v33, %v411_v27 }
 0x130   :  { %820 = vst [vmem:[#allocation8 + $0x8] sm:$0xff] %v748_v30   ;;  %828 = vst [vmem:[#allocation8 + $0x48] sm:$0xff] %v788_v31  }
 0x131   :  { %744 = vst [vmem:[#allocation8] sm:$0xff] %v743_v34   ;;  %827 = vst [vmem:[#allocation8 + $0x40] sm:$0xff] %v783_v35  }
 0x133   :  { %v881_v36 = vpop.f32.mrb[4].mxu0  ;;  %v897_v37 = vpop.f32.mrb[4].mxu1 }
 0x134   :  { %v363_v38 = vpop.f32.mrb[5].mxu0  ;;  %v427_v39 = vpop.f32.mrb[5].mxu1 }
 0x135   :  { %v882_v40 = vpop.f32.mrb[6].mxu0  ;;  %v898_v41 = vpop.f32.mrb[6].mxu1 }
 0x136   :  { %v758_v42 = vpack.c.bf16 %v882_v40, %v881_v36  ;;  %v798_v43 = vpack.c.bf16 %v898_v41, %v897_v37  ;;  %v366_v44 = vpop.f32.mrb[7].mxu0  ;;  %v430_v45 = vpop.f32.mrb[7].mxu1 }
 0x137   :  { %v753_v46 = vpack.c.bf16 %v366_v44, %v363_v38  ;;  %v793_v47 = vpack.c.bf16 %v430_v45, %v427_v39 }
 0x138   :  { %822 = vst [vmem:[#allocation8 + $0x18] sm:$0xff] %v758_v42   ;;  %830 = vst [vmem:[#allocation8 + $0x58] sm:$0xff] %v798_v43  }
 0x139   :  { %821 = vst [vmem:[#allocation8 + $0x10] sm:$0xff] %v753_v46   ;;  %829 = vst [vmem:[#allocation8 + $0x50] sm:$0xff] %v793_v47  }
 0x13b   :  { %v885_v48 = vpop.f32.mrb[8].mxu0  ;;  %v901_v49 = vpop.f32.mrb[8].mxu1 }
 0x13c   :  { %v379_v50 = vpop.f32.mrb[9].mxu0  ;;  %v443_v51 = vpop.f32.mrb[9].mxu1 }
 0x13d   :  { %v886_v52 = vpop.f32.mrb[10].mxu0  ;;  %v902_v53 = vpop.f32.mrb[10].mxu1 }
 0x13e   :  { %v768_v54 = vpack.c.bf16 %v886_v52, %v885_v48  ;;  %v808_v55 = vpack.c.bf16 %v902_v53, %v901_v49  ;;  %v382_v56 = vpop.f32.mrb[11].mxu0  ;;  %v446_v57 = vpop.f32.mrb[11].mxu1 }
 0x13f   :  { %v763_v58 = vpack.c.bf16 %v382_v56, %v379_v50  ;;  %v803_v59 = vpack.c.bf16 %v446_v57, %v443_v51 }
 0x140   :  { %824 = vst [vmem:[#allocation8 + $0x28] sm:$0xff] %v768_v54   ;;  %832 = vst [vmem:[#allocation8 + $0x68] sm:$0xff] %v808_v55  }
 0x141   :  { %823 = vst [vmem:[#allocation8 + $0x20] sm:$0xff] %v763_v58   ;;  %831 = vst [vmem:[#allocation8 + $0x60] sm:$0xff] %v803_v59  }
 0x143   :  { %v889_v60 = vpop.f32.mrb[12].mxu0  ;;  %v905_v61 = vpop.f32.mrb[12].mxu1 }
 0x144   :  { %v395_v62 = vpop.f32.mrb[13].mxu0  ;;  %v459_v63 = vpop.f32.mrb[13].mxu1 }
 0x145   :  { %v890_v0 = vpop.f32.mrb[14].mxu0  ;;  %v906_v1 = vpop.f32.mrb[14].mxu1 }
 0x146   :  { %v778_v2 = vpack.c.bf16 %v890_v0, %v889_v60  ;;  %v818_v3 = vpack.c.bf16 %v906_v1, %v905_v61  ;;  %v398_v4 = vpop.f32.mrb[15].mxu0  ;;  %v462_v5 = vpop.f32.mrb[15].mxu1 }
 0x147   :  { %v773_v6 = vpack.c.bf16 %v398_v4, %v395_v62  ;;  %v813_v7 = vpack.c.bf16 %v462_v5, %v459_v63 }
 0x148   :  { %826 = vst [vmem:[#allocation8 + $0x38] sm:$0xff] %v778_v2   ;;  %834 = vst [vmem:[#allocation8 + $0x78] sm:$0xff] %v818_v3  }
 0x149   :  { %825 = vst [vmem:[#allocation8 + $0x30] sm:$0xff] %v773_v6   ;;  %833 = vst [vmem:[#allocation8 + $0x70] sm:$0xff] %v813_v7  }
 0x14a   :  { %1032 = shalt.err (!%p1029_p0)
}
 0x14b   :  { %s1033_s29 = scalar_lea.hbm %s1137_s3, 2048 }
 0x14c   :  { %p1034_p1 = scmp.ne.s32.totalorder %s1137_s3, %s1033_s29  ;;  %p1037_p2 = scmp.lt.u32.totalorder %s1033_s29, %s1137_s3 }
 0x14e   :  { %p1039_p3 = pnand %p1037_p2, %p1034_p1 }
 0x150   :  { %1042 = shalt.err (!%p1039_p3)
}
 0x151   :  { %645 = dma.vmem_to_hbm [thread:$0]  %s640_s25, 2048, %s1137_s3, [#allocation4], %s1050_s22, %s1050_s22, %s1051_s23  }
 0x152   :  { %1047 = dma.done.wait [#allocation4], 2048  }
 0x153   :  { %1048 = vsyncadd [#allocation4], 4294965248 }
 0x154   :  { %649 = vsyncpa [#allocation3], 1 }
 0x155   :  { %650 = vsyncpa [#allocation6], 1 }
 0x156   :  { %651 = vsyncpa [#allocation4], 1 }

</bundles_post_ra>
